<compile_context>
chip_gen: v7x
topology: tpu7x:2x2x1
jax: 0.10.0
libtpu: 0.0.40
codegen_flags: <defaults>
</compile_context>

<pallas_src>
import functools

import jax
import jax.numpy as jnp
from jax.experimental import pallas as pl
from jax.experimental.pallas import tpu as pltpu


def _round_up(x, m):
    return ((x + m - 1) // m) * m


def _sublane_align(dtype):
    """Sublane multiple required for a block's second-to-last dim."""
    itemsize = jnp.dtype(dtype).itemsize
    return 8 * max(1, 4 // itemsize)          # f32 -> 8, bf16 -> 16, int8 -> 32


def _vmem_bytes(shape, dtype):
    """VMEM footprint of one buffer including (sublane, 128-lane) padding."""
    itemsize = jnp.dtype(dtype).itemsize
    if len(shape) == 0:
        return 4
    if len(shape) == 1:
        return _round_up(int(shape[0]), 128) * itemsize
    lane = _round_up(int(shape[-1]), 128)
    sub = _round_up(int(shape[-2]), _sublane_align(dtype))
    lead = 1
    for d in shape[:-2]:
        lead *= int(d)
    return lead * sub * lane * itemsize


def timeblock_kernel(x_ref, w_ref, b_ref, o_ref, *,
                     kernel_size, in_channels, out_channels, cpad):
    """x_ref: (TR, T*Cin); w_ref: (K*Cin, 2*cpad); b_ref: (1, 2*cpad) f32;
    o_ref: (TR, T_out*Cout)."""
    K, Cin, Cout = kernel_size, in_channels, out_channels
    x = x_ref[...]                                   # (TR, T*Cin), compute dtype
    T = x.shape[1] // Cin
    T_out = T - K + 1
    w = w_ref[...]                                   # (K*Cin, 2*cpad)
    b = b_ref[...]                                   # (1, 2*cpad), f32

    pieces = []
    for t in range(T_out):                           # T_out is small & static
        # im2col row for output step t == contiguous lane slice (no copies of
        # shifted views, no reshape).
        xt = x[:, t * Cin:(t + K) * Cin]             # (TR, K*Cin)
        acc = jnp.dot(xt, w, preferred_element_type=jnp.float32) + b
        lin = acc[:, :cpad]                          # conv1 + conv3 (whole vregs)
        gate = acc[:, cpad:]                         # conv2
        y = jnp.maximum(lin + jax.nn.sigmoid(gate), 0.0)
        pieces.append(y[:, :Cout].astype(o_ref.dtype))
    # One lane-dense store of the whole (TR, T_out*Cout) tile.
    o_ref[...] = jnp.concatenate(pieces, axis=-1)


def _working_set_bytes(tr, T, Cin, T_out, Cout, K, cpad, compute_dtype, out_dtype):
    ws = 0
    ws += 2 * _vmem_bytes((tr, T * Cin), compute_dtype)      # double-buffered input tile
    ws += 2 * _vmem_bytes((tr, T_out * Cout), out_dtype)     # double-buffered output tile
    ws += _vmem_bytes((tr, T * Cin), compute_dtype)          # loaded x value
    ws += _vmem_bytes((tr, K * Cin), compute_dtype)          # per-step lhs slice
    ws += 2 * _vmem_bytes((tr, 2 * cpad), jnp.float32)       # f32 acc + epilogue temps
    ws += _vmem_bytes((tr, T_out * Cout), out_dtype)         # concatenated store value
    ws += 2 * (_vmem_bytes((K * Cin, 2 * cpad), compute_dtype)
               + _vmem_bytes((1, 2 * cpad), jnp.float32))    # weights + bias
    return ws


def _vmem_capacity_bytes():
    try:
        info = pltpu.get_tpu_info()
        cap = getattr(info, "vmem_capacity_bytes", None)
        if cap:
            return int(cap)
    except Exception:
        pass
    return 64 * 1024 * 1024          # conservative default (v7x per-core VMEM)


def _pick_row_tile(R, T, Cin, T_out, Cout, K, cpad, compute_dtype, out_dtype,
                   budget_bytes):
    align = max(_sublane_align(compute_dtype), _sublane_align(out_dtype))
    if R <= align:
        return R                     # single full block; dims are exempt
    cap = _round_up(R, align)
    best = align
    tr = align
    limit = min(cap, 8192)
    while tr <= limit:               # working set is monotonic in tr
        if _working_set_bytes(tr, T, Cin, T_out, Cout, K, cpad,
                              compute_dtype, out_dtype) <= budget_bytes:
            best = tr
        tr += align
    tr = min(best, cap)
    # Keep >= 2 grid steps so v7x's two TensorCores / the DMA pipeline can
    # overlap work.
    if pl.cdiv(R, tr) < 2:
        tr = max(align, _round_up(pl.cdiv(R, 2), align))
    return tr


def time_block(x, w1, b1, w2, b2, w3, b3, *, kernel_size=3, row_tile=None,
               compute_dtype=jnp.bfloat16, vmem_budget_bytes=None):
    """x: (B, N, T, C_in) -> (B, N, T-K+1, C_out).

    w{1,2,3}: (K, C_in, C_out) with W[k] = torch_weight[:, :, 0, k].T
    b{1,2,3}: (C_out,) or (1, C_out)
    """
    B, N, T, Cin = x.shape
    K = kernel_size
    Cout = w1.shape[-1]
    T_out = T - K + 1
    R = B * N
    out_dtype = x.dtype
    compute_dtype = jnp.dtype(compute_dtype)

    # Fold conv1+conv3 (both linear, summed before the nonlinearity) and conv2
    # into one (K*Cin, 2*cpad) weight; each Cout segment zero-padded to a
    # 128-lane multiple so epilogue slices are whole-vreg.
    cpad = _round_up(Cout, 128)
    w13 = (w1.astype(jnp.float32) + w3.astype(jnp.float32)).reshape(K * Cin, Cout)
    w2f = w2.astype(jnp.float32).reshape(K * Cin, Cout)
    wc = jnp.zeros((K * Cin, 2 * cpad), jnp.float32)
    wc = wc.at[:, :Cout].set(w13).at[:, cpad:cpad + Cout].set(w2f)
    wc = wc.astype(compute_dtype)
    bc = jnp.zeros((1, 2 * cpad), jnp.float32)
    bc = bc.at[0, :Cout].set((jnp.reshape(b1, (-1,)) + jnp.reshape(b3, (-1,))).astype(jnp.float32))
    bc = bc.at[0, cpad:cpad + Cout].set(jnp.reshape(b2, (-1,)).astype(jnp.float32))

    # Lane-dense 2-D view of the input (contiguous, metadata-only reshape);
    # bf16 MXU operands, f32 accumulate in-kernel.  No wrapper-side jnp.pad.
    xr = x.reshape(R, T * Cin).astype(compute_dtype)

    cap = _vmem_capacity_bytes()
    budget = (vmem_budget_bytes if vmem_budget_bytes is not None
              else min(cap // 3, 28 * 1024 * 1024))
    vmem_limit = min((cap * 3) // 4, 112 * 1024 * 1024)

    if row_tile is not None:
        TR = row_tile
    else:
        TR = _pick_row_tile(R, T, Cin, T_out, Cout, K, cpad,
                            compute_dtype, out_dtype, budget)

    grid = (pl.cdiv(R, TR),)
    kern = functools.partial(timeblock_kernel, kernel_size=K, in_channels=Cin,
                             out_channels=Cout, cpad=cpad)

    out2d = pl.pallas_call(
        kern,
        out_shape=jax.ShapeDtypeStruct((R, T_out * Cout), out_dtype),
        grid=grid,
        in_specs=[
            pl.BlockSpec((TR, T * Cin), lambda i: (i, 0)),
            pl.BlockSpec((K * Cin, 2 * cpad), lambda i: (0, 0)),
            pl.BlockSpec((1, 2 * cpad), lambda i: (0, 0)),
        ],
        out_specs=pl.BlockSpec((TR, T_out * Cout), lambda i: (i, 0)),
        compiler_params=pltpu.CompilerParams(
            dimension_semantics=("parallel",),
            vmem_limit_bytes=vmem_limit),
        cost_estimate=pl.CostEstimate(
            flops=2 * R * T_out * (K * Cin) * (2 * cpad),
            transcendentals=R * T_out * cpad,
            bytes_accessed=(R * T * Cin * compute_dtype.itemsize
                            + R * T_out * Cout * jnp.dtype(out_dtype).itemsize
                            + int(wc.size) * compute_dtype.itemsize
                            + int(bc.size) * 4)),
    )(xr, wc, bc)

    # Contiguous (metadata-only) reshape back to (B, N, T_out, Cout).
    return out2d.reshape(B, N, T_out, Cout)


def _reference(x, w1, b1, w2, b2, w3, b3, kernel_size=3):
    """Pure-JAX f32 reference of the module's math (per-tap matmuls)."""
    K = kernel_size
    T = x.shape[2]
    T_out = T - K + 1
    xf = x.astype(jnp.float32)

    def conv(w, b):
        acc = jnp.reshape(b, (1, 1, 1, -1)).astype(jnp.float32)
        for k in range(K):
            acc = acc + jnp.einsum("bntc,co->bnto",
                                   xf[:, :, k:k + T_out, :],
                                   w[k].astype(jnp.float32))
        return acc

    c1 = conv(w1, b1)
    c2 = conv(w2, b2)
    c3 = conv(w3, b3)
    return jnp.maximum(c1 + jax.nn.sigmoid(c2) + c3, 0.0)


if __name__ == "__main__":
    # Small shapes consistent with the module:
    # batch=2, num_nodes=4, num_timesteps=8, in_channels=4, out_channels=8, K=3
    B, N, T, Cin, Cout, K = 2, 4, 8, 4, 8, 3

    key = jax.random.PRNGKey(0)
    kx, k1, k2, k3, kb1, kb2, kb3 = jax.random.split(key, 7)

    x = jax.random.normal(kx, (B, N, T, Cin), dtype=jnp.float32)
    scale = 1.0 / (Cin * K) ** 0.5
    w1 = jax.random.uniform(k1, (K, Cin, Cout), jnp.float32, -scale, scale)
    w2 = jax.random.uniform(k2, (K, Cin, Cout), jnp.float32, -scale, scale)
    w3 = jax.random.uniform(k3, (K, Cin, Cout), jnp.float32, -scale, scale)
    b1 = jax.random.uniform(kb1, (Cout,), jnp.float32, -scale, scale)
    b2 = jax.random.uniform(kb2, (Cout,), jnp.float32, -scale, scale)
    b3 = jax.random.uniform(kb3, (Cout,), jnp.float32, -scale, scale)

    ref = _reference(x, w1, b1, w2, b2, w3, b3, kernel_size=K)

    # Exact-math check: f32 MXU operands.
    out_f32 = jax.block_until_ready(
        time_block(x, w1, b1, w2, b2, w3, b3, kernel_size=K,
                   compute_dtype=jnp.float32))
    assert out_f32.shape == (B, N, T - K + 1, Cout), out_f32.shape
    assert jnp.allclose(out_f32, ref, atol=1e-5, rtol=1e-5), "f32 kernel mismatch"

    # Default performance path: bf16 MXU operands, f32 accumulate/epilogue.
    out_bf16 = jax.block_until_ready(
        time_block(x, w1, b1, w2, b2, w3, b3, kernel_size=K))
    assert out_bf16.shape == (B, N, T - K + 1, Cout), out_bf16.shape
    max_err = float(jnp.max(jnp.abs(out_bf16 - ref)))
    assert max_err < 5e-2, f"bf16 kernel error too large: {max_err}"

    print("KERNEL_OK")
</pallas_src>

<mosaic_0001>
module attributes {stable_mosaic.version = 11 : i64} {
  func.func @timeblock_kernel(%arg0: i32, %arg1: memref<8x32xf32, #tpu.memory_space<vmem>>, %arg2: memref<12x256xf32, #tpu.memory_space<vmem>>, %arg3: memref<1x256xf32, #tpu.memory_space<vmem>>, %arg4: memref<8x48xf32, #tpu.memory_space<vmem>>) attributes {dimension_semantics = [#tpu.dimension_semantics<parallel>], iteration_bounds = array<i64: 1>, scalar_prefetch = 0 : i64, scratch_operands = 0 : i64, tpu.core_type = #tpu.core_type<tc>, window_params = [{transform_indices = @transform_0, window_bounds = array<i64: 8, 32>}, {pipeline_mode = #tpu.pipeline_mode<synchronous>, transform_indices = @transform_1, window_bounds = array<i64: 12, 256>}, {pipeline_mode = #tpu.pipeline_mode<synchronous>, transform_indices = @transform_2, window_bounds = array<i64: 1, 256>}, {transform_indices = @transform_3, window_bounds = array<i64: 8, 48>}]} {
    %c0 = arith.constant 0 : index
    %c0_0 = arith.constant 0 : index
    %0 = vector.load %arg1[%c0, %c0_0] : memref<8x32xf32, #tpu.memory_space<vmem>>, vector<8x32xf32>
    %c0_1 = arith.constant 0 : index
    %c0_2 = arith.constant 0 : index
    %1 = vector.load %arg2[%c0_1, %c0_2] : memref<12x256xf32, #tpu.memory_space<vmem>>, vector<12x256xf32>
    %c0_3 = arith.constant 0 : index
    %c0_4 = arith.constant 0 : index
    %2 = vector.load %arg3[%c0_3, %c0_4] : memref<1x256xf32, #tpu.memory_space<vmem>>, vector<1x256xf32>
    %3 = vector.extract_strided_slice %0 {offsets = [0, 0], sizes = [8, 12], strides = [1, 1]} : vector<8x32xf32> to vector<8x12xf32>
    %cst = arith.constant dense<0.000000e+00> : vector<8x256xf32>
    %4 = tpu.matmul %3, %1, %cst {dimension_numbers = #tpu.dot_dimension_numbers<[1], [0], [0], [1], [0, 0, 1, 1], [], []>} : vector<8x12xf32>, vector<12x256xf32>, vector<8x256xf32> -> vector<8x256xf32>
    %5 = vector.broadcast %2 : vector<1x256xf32> to vector<8x256xf32>
    %6 = arith.addf %4, %5 : vector<8x256xf32>
    %7 = vector.extract_strided_slice %6 {offsets = [0, 0], sizes = [8, 128], strides = [1, 1]} : vector<8x256xf32> to vector<8x128xf32>
    %8 = vector.extract_strided_slice %6 {offsets = [0, 128], sizes = [8, 128], strides = [1, 1]} : vector<8x256xf32> to vector<8x128xf32>
    %9 = arith.negf %8 : vector<8x128xf32>
    %10 = math.exp %9 : vector<8x128xf32>
    %cst_5 = arith.constant 1.000000e+00 : f32
    %11 = vector.broadcast %cst_5 : f32 to vector<8x128xf32>
    %12 = arith.addf %11, %10 : vector<8x128xf32>
    %13 = arith.divf %11, %12 : vector<8x128xf32>
    %14 = arith.addf %7, %13 : vector<8x128xf32>
    %cst_6 = arith.constant 0.000000e+00 : f32
    %15 = vector.broadcast %cst_6 : f32 to vector<8x128xf32>
    %16 = arith.maximumf %14, %15 : vector<8x128xf32>
    %17 = vector.extract_strided_slice %16 {offsets = [0, 0], sizes = [8, 8], strides = [1, 1]} : vector<8x128xf32> to vector<8x8xf32>
    %18 = vector.extract_strided_slice %0 {offsets = [0, 4], sizes = [8, 12], strides = [1, 1]} : vector<8x32xf32> to vector<8x12xf32>
    %cst_7 = arith.constant dense<0.000000e+00> : vector<8x256xf32>
    %19 = tpu.matmul %18, %1, %cst_7 {dimension_numbers = #tpu.dot_dimension_numbers<[1], [0], [0], [1], [0, 0, 1, 1], [], []>} : vector<8x12xf32>, vector<12x256xf32>, vector<8x256xf32> -> vector<8x256xf32>
    %20 = vector.broadcast %2 : vector<1x256xf32> to vector<8x256xf32>
    %21 = arith.addf %19, %20 : vector<8x256xf32>
    %22 = vector.extract_strided_slice %21 {offsets = [0, 0], sizes = [8, 128], strides = [1, 1]} : vector<8x256xf32> to vector<8x128xf32>
    %23 = vector.extract_strided_slice %21 {offsets = [0, 128], sizes = [8, 128], strides = [1, 1]} : vector<8x256xf32> to vector<8x128xf32>
    %24 = arith.negf %23 : vector<8x128xf32>
    %25 = math.exp %24 : vector<8x128xf32>
    %cst_8 = arith.constant 1.000000e+00 : f32
    %26 = vector.broadcast %cst_8 : f32 to vector<8x128xf32>
    %27 = arith.addf %26, %25 : vector<8x128xf32>
    %28 = arith.divf %26, %27 : vector<8x128xf32>
    %29 = arith.addf %22, %28 : vector<8x128xf32>
    %cst_9 = arith.constant 0.000000e+00 : f32
    %30 = vector.broadcast %cst_9 : f32 to vector<8x128xf32>
    %31 = arith.maximumf %29, %30 : vector<8x128xf32>
    %32 = vector.extract_strided_slice %31 {offsets = [0, 0], sizes = [8, 8], strides = [1, 1]} : vector<8x128xf32> to vector<8x8xf32>
    %33 = vector.extract_strided_slice %0 {offsets = [0, 8], sizes = [8, 12], strides = [1, 1]} : vector<8x32xf32> to vector<8x12xf32>
    %cst_10 = arith.constant dense<0.000000e+00> : vector<8x256xf32>
    %34 = tpu.matmul %33, %1, %cst_10 {dimension_numbers = #tpu.dot_dimension_numbers<[1], [0], [0], [1], [0, 0, 1, 1], [], []>} : vector<8x12xf32>, vector<12x256xf32>, vector<8x256xf32> -> vector<8x256xf32>
    %35 = vector.broadcast %2 : vector<1x256xf32> to vector<8x256xf32>
    %36 = arith.addf %34, %35 : vector<8x256xf32>
    %37 = vector.extract_strided_slice %36 {offsets = [0, 0], sizes = [8, 128], strides = [1, 1]} : vector<8x256xf32> to vector<8x128xf32>
    %38 = vector.extract_strided_slice %36 {offsets = [0, 128], sizes = [8, 128], strides = [1, 1]} : vector<8x256xf32> to vector<8x128xf32>
    %39 = arith.negf %38 : vector<8x128xf32>
    %40 = math.exp %39 : vector<8x128xf32>
    %cst_11 = arith.constant 1.000000e+00 : f32
    %41 = vector.broadcast %cst_11 : f32 to vector<8x128xf32>
    %42 = arith.addf %41, %40 : vector<8x128xf32>
    %43 = arith.divf %41, %42 : vector<8x128xf32>
    %44 = arith.addf %37, %43 : vector<8x128xf32>
    %cst_12 = arith.constant 0.000000e+00 : f32
    %45 = vector.broadcast %cst_12 : f32 to vector<8x128xf32>
    %46 = arith.maximumf %44, %45 : vector<8x128xf32>
    %47 = vector.extract_strided_slice %46 {offsets = [0, 0], sizes = [8, 8], strides = [1, 1]} : vector<8x128xf32> to vector<8x8xf32>
    %48 = vector.extract_strided_slice %0 {offsets = [0, 12], sizes = [8, 12], strides = [1, 1]} : vector<8x32xf32> to vector<8x12xf32>
    %cst_13 = arith.constant dense<0.000000e+00> : vector<8x256xf32>
    %49 = tpu.matmul %48, %1, %cst_13 {dimension_numbers = #tpu.dot_dimension_numbers<[1], [0], [0], [1], [0, 0, 1, 1], [], []>} : vector<8x12xf32>, vector<12x256xf32>, vector<8x256xf32> -> vector<8x256xf32>
    %50 = vector.broadcast %2 : vector<1x256xf32> to vector<8x256xf32>
    %51 = arith.addf %49, %50 : vector<8x256xf32>
    %52 = vector.extract_strided_slice %51 {offsets = [0, 0], sizes = [8, 128], strides = [1, 1]} : vector<8x256xf32> to vector<8x128xf32>
    %53 = vector.extract_strided_slice %51 {offsets = [0, 128], sizes = [8, 128], strides = [1, 1]} : vector<8x256xf32> to vector<8x128xf32>
    %54 = arith.negf %53 : vector<8x128xf32>
    %55 = math.exp %54 : vector<8x128xf32>
    %cst_14 = arith.constant 1.000000e+00 : f32
    %56 = vector.broadcast %cst_14 : f32 to vector<8x128xf32>
    %57 = arith.addf %56, %55 : vector<8x128xf32>
    %58 = arith.divf %56, %57 : vector<8x128xf32>
    %59 = arith.addf %52, %58 : vector<8x128xf32>
    %cst_15 = arith.constant 0.000000e+00 : f32
    %60 = vector.broadcast %cst_15 : f32 to vector<8x128xf32>
    %61 = arith.maximumf %59, %60 : vector<8x128xf32>
    %62 = vector.extract_strided_slice %61 {offsets = [0, 0], sizes = [8, 8], strides = [1, 1]} : vector<8x128xf32> to vector<8x8xf32>
    %63 = vector.extract_strided_slice %0 {offsets = [0, 16], sizes = [8, 12], strides = [1, 1]} : vector<8x32xf32> to vector<8x12xf32>
    %cst_16 = arith.constant dense<0.000000e+00> : vector<8x256xf32>
    %64 = tpu.matmul %63, %1, %cst_16 {dimension_numbers = #tpu.dot_dimension_numbers<[1], [0], [0], [1], [0, 0, 1, 1], [], []>} : vector<8x12xf32>, vector<12x256xf32>, vector<8x256xf32> -> vector<8x256xf32>
    %65 = vector.broadcast %2 : vector<1x256xf32> to vector<8x256xf32>
    %66 = arith.addf %64, %65 : vector<8x256xf32>
    %67 = vector.extract_strided_slice %66 {offsets = [0, 0], sizes = [8, 128], strides = [1, 1]} : vector<8x256xf32> to vector<8x128xf32>
    %68 = vector.extract_strided_slice %66 {offsets = [0, 128], sizes = [8, 128], strides = [1, 1]} : vector<8x256xf32> to vector<8x128xf32>
    %69 = arith.negf %68 : vector<8x128xf32>
    %70 = math.exp %69 : vector<8x128xf32>
    %cst_17 = arith.constant 1.000000e+00 : f32
    %71 = vector.broadcast %cst_17 : f32 to vector<8x128xf32>
    %72 = arith.addf %71, %70 : vector<8x128xf32>
    %73 = arith.divf %71, %72 : vector<8x128xf32>
    %74 = arith.addf %67, %73 : vector<8x128xf32>
    %cst_18 = arith.constant 0.000000e+00 : f32
    %75 = vector.broadcast %cst_18 : f32 to vector<8x128xf32>
    %76 = arith.maximumf %74, %75 : vector<8x128xf32>
    %77 = vector.extract_strided_slice %76 {offsets = [0, 0], sizes = [8, 8], strides = [1, 1]} : vector<8x128xf32> to vector<8x8xf32>
    %78 = vector.extract_strided_slice %0 {offsets = [0, 20], sizes = [8, 12], strides = [1, 1]} : vector<8x32xf32> to vector<8x12xf32>
    %cst_19 = arith.constant dense<0.000000e+00> : vector<8x256xf32>
    %79 = tpu.matmul %78, %1, %cst_19 {dimension_numbers = #tpu.dot_dimension_numbers<[1], [0], [0], [1], [0, 0, 1, 1], [], []>} : vector<8x12xf32>, vector<12x256xf32>, vector<8x256xf32> -> vector<8x256xf32>
    %80 = vector.broadcast %2 : vector<1x256xf32> to vector<8x256xf32>
    %81 = arith.addf %79, %80 : vector<8x256xf32>
    %82 = vector.extract_strided_slice %81 {offsets = [0, 0], sizes = [8, 128], strides = [1, 1]} : vector<8x256xf32> to vector<8x128xf32>
    %83 = vector.extract_strided_slice %81 {offsets = [0, 128], sizes = [8, 128], strides = [1, 1]} : vector<8x256xf32> to vector<8x128xf32>
    %84 = arith.negf %83 : vector<8x128xf32>
    %85 = math.exp %84 : vector<8x128xf32>
    %cst_20 = arith.constant 1.000000e+00 : f32
    %86 = vector.broadcast %cst_20 : f32 to vector<8x128xf32>
    %87 = arith.addf %86, %85 : vector<8x128xf32>
    %88 = arith.divf %86, %87 : vector<8x128xf32>
    %89 = arith.addf %82, %88 : vector<8x128xf32>
    %cst_21 = arith.constant 0.000000e+00 : f32
    %90 = vector.broadcast %cst_21 : f32 to vector<8x128xf32>
    %91 = arith.maximumf %89, %90 : vector<8x128xf32>
    %92 = vector.extract_strided_slice %91 {offsets = [0, 0], sizes = [8, 8], strides = [1, 1]} : vector<8x128xf32> to vector<8x8xf32>
    %93 = tpu.concatenate %17, %32, %47, %62, %77, %92 in 1 : vector<8x8xf32>, vector<8x8xf32>, vector<8x8xf32>, vector<8x8xf32>, vector<8x8xf32>, vector<8x8xf32> -> vector<8x48xf32>
    %c0_22 = arith.constant 0 : index
    %c0_23 = arith.constant 0 : index
    %94 = vector.load %arg4[%c0_22, %c0_23] : memref<8x48xf32, #tpu.memory_space<vmem>>, vector<8x48xf32>
    tpu.vector_store %arg4[%c0_22, %c0_23], %93 {strides = array<i32>} : memref<8x48xf32, #tpu.memory_space<vmem>>, vector<8x48xf32>,
    return
  }
  func.func @transform_0(%arg0: i32) -> (i32, i32) {
    %c0_i32 = arith.constant 0 : i32
    %c0_i32_0 = arith.constant 0 : i32
    return %arg0, %c0_i32 : i32, i32
  }
  func.func @transform_1(%arg0: i32) -> (i32, i32) {
    %c0_i32 = arith.constant 0 : i32
    %c0_i32_0 = arith.constant 0 : i32
    %c0_i32_1 = arith.constant 0 : i32
    return %c0_i32, %c0_i32_0 : i32, i32
  }
  func.func @transform_2(%arg0: i32) -> (i32, i32) {
    %c0_i32 = arith.constant 0 : i32
    %c0_i32_0 = arith.constant 0 : i32
    %c0_i32_1 = arith.constant 0 : i32
    return %c0_i32, %c0_i32_0 : i32, i32
  }
  func.func @transform_3(%arg0: i32) -> (i32, i32) {
    %c0_i32 = arith.constant 0 : i32
    %c0_i32_0 = arith.constant 0 : i32
    return %arg0, %c0_i32 : i32, i32
  }
}

</mosaic_0001>

<bundles_post_ra>
// kernel: tpu_custom_call.1
= control target key start
LH: loop header
LB: loop body
LE: loop exit
PB: predicated region body
PF: predicated region fallthrough
CT: control target
= control target key end

     0   :  { %8 = vsyncpa [#allocation3], 0  ;;  %s904_s0 = inlined_call_operand.hbm [shape: f32[8,32], index: 0, kind: input, shape index: {}]   ;;  %s905_s1 = inlined_call_operand.hbm [shape: f32[12,256], index: 1, kind: input, shape index: {}]   ;;  %s906_s2 = inlined_call_operand.vmem [shape: f32[1,256], index: 2, kind: input, shape index: {}]   ;;  %s907_s3 = inlined_call_operand.hbm [shape: f32[8,48], index: 3, kind: output, shape index: {}]  }
   0x1   :  { %9 = vsyncpa [#allocation6], 0 }
   0x2   :  { %10 = vsyncpa [#allocation4], 0  ;;  %s783_s12 = smov [#allocation2]   ;;  %s784_s14 = smov [#allocation5]  }
   0x3   :  { %s17_s13 = sshll.u32 %s783_s12, 4  ;;  %s26_s15 = sshll.u32 %s784_s14, 4  ;;  %s18_s13 = int_to_ptr.vmem [resolvable:$true] %s17_s13  ;;  %s819_s15 = int_to_ptr.vmem [resolvable:$true] %s26_s15 }
   0x4   :  { %s711_s18 = scalar_lea.hbm %s904_s0, 128 }
   0x5   :  { %p712_p0 = scmp.ne.s32.totalorder %s904_s0, %s711_s18  ;;  %p715_p1 = scmp.lt.u32.totalorder %s711_s18, %s904_s0 }
   0x7   :  { %p717_p2 = pnand %p715_p1, %p712_p0 }
   0x9   :  { %720 = shalt.err (!%p717_p2)
}
   0xa   :  { %s721_s23 = scalar_lea.vmem %s18_s13, 128  ;;  %p726_p4 = scmp.lt.s32.totalorder %s18_s13, %s18_s13 }
   0xb   :  { %p722_p3 = scmp.ne.s32.totalorder %s18_s13, %s721_s23  ;;  %p727_p5 = scmp.lt.s32.totalorder %s721_s23, %s721_s23 }
   0xd   :  { %p728_p6 = por %p727_p5, %p726_p4 }
   0xf   :  { %p729_p7 = pnand %p728_p6, %p722_p3 }
  0x11   :  { %732 = shalt.err (!%p729_p7)
}
  0x12   :  { %20 = dma.hbm_to_vmem [thread:$0]  %s904_s0, 128, %s18_s13, [#allocation3]  }
  0x13   :  { %s733_s28 = scalar_lea.hbm %s905_s1, 512 }
  0x14   :  { %p734_p8 = scmp.ne.s32.totalorder %s905_s1, %s733_s28  ;;  %p737_p9 = scmp.lt.u32.totalorder %s733_s28, %s905_s1 }
  0x16   :  { %p739_p10 = pnand %p737_p9, %p734_p8 }
  0x18   :  { %742 = shalt.err (!%p739_p10)
}
  0x19   :  { %s743_s6 = scalar_lea.vmem %s819_s15, 512  ;;  %p748_p12 = scmp.lt.s32.totalorder %s819_s15, %s819_s15 }
  0x1a   :  { %p744_p11 = scmp.ne.s32.totalorder %s819_s15, %s743_s6  ;;  %p749_p13 = scmp.lt.s32.totalorder %s743_s6, %s743_s6 }
  0x1c   :  { %p750_p0 = por %p749_p13, %p748_p12 }
  0x1e   :  { %p751_p1 = pnand %p750_p0, %p744_p11 }
  0x20   :  { %754 = shalt.err (!%p751_p1)
}
  0x21   :  { %s785_s0 = smov 256   ;;  %s786_s7 = smov 16  }
  0x22   :  { %32 = dma.hbm_to_vmem [thread:$0]  %s905_s1, 512, %s819_s15, [#allocation6], %s785_s0, %s785_s0, %s786_s7  }
  0x23   :  { %777 = dma.done.wait [#allocation3], 128  }
  0x24   :  { %778 = vsyncadd [#allocation3], 4294967168 }
  0x25   :  { %779 = dma.done.wait [#allocation6], 512  }
  0x26   :  { %780 = vsyncadd [#allocation6], 4294966784  ;;  %v787_v0 = vmov 0.0   ;;  %vm62_vm0 = vcmask 1043456   ;;  %vm788_vm1 = vmmov 1   ;;  %v41_v2 = vld [vmem:[#allocation2] sm:$0xff]  ;;  %v48_v14 = vlaneseq }
  0x27   :  { %133 = vmatprep.mubr.f32.mxu0 %v787_v0  ;;  %216 = vmatprep.mubr.f32.mxu1 %v787_v0  ;;  %vm851_vm2 = vmpackc.low %vm62_vm0, %vm788_vm1  ;;  %v43_v3 = vld [vmem:[#allocation5 + $0x8] sm:$0xff]  ;;  %v45_v4 = vld [vmem:[#allocation5 + $0x18] sm:$0xf]  ;;  %s789_s10 = smov 124   ;;  %s790_s11 = smov 116   ;;  %vm58_vm3 = vcmask 97280  }
  0x28   :  { %148 = vrot.lane.b32.xlu0 %v41_v2, %s789_s10  ;;  %314 = vrot.lane.b32.xlu1 %v41_v2, %s790_s11  ;;  %v635_v5 = vpack.c.bf16 %v45_v4, %v43_v3  ;;  %v42_v6 = vld [vmem:[#allocation5] sm:$0xff]  ;;  %v44_v7 = vld [vmem:[#allocation5 + $0x10] sm:$0xf]  ;;  %s791_s1 = smov 120   ;;  %s792_s12 = smov 112   ;;  %v49_v15 = vshrl.u32 %v48_v14, 7 }
  0x29   :  { %v638_v8 = vpack.c.bf16 %v44_v7, %v42_v6  ;;  %s793_s13 = smov 108   ;;  %v46_v17 = vld [vmem:[%s906_s2] sm:$0x3]  ;;  %s794_s2 = smov 8   ;;  %vm583_vm4 = vcmask 64512   ;;  %vm585_vm5 = vcmask 130048  }
  0x2a   :  { %637 = vmatprep.subr.msk.bf16.mxu0 %vm851_vm2, %v635_v5  ;;  %643 = vmatprep.subr.msk.bf16.mxu1 %vm851_vm2, %v635_v5  ;;  %v54_v16 = vsub.s32 1, %v49_v15  ;;  %v50_v25 = vsub.s32 0, %v49_v15  ;;  %s795_s16 = smov 24   ;;  %s796_s17 = smov 32   ;;  %vm587_vm6 = vcmask 195584   ;;  %vm589_vm7 = vcmask 261120  }
  0x2b   :  { %640 = vmatpush1.bf16.msk.msra.mxu0 %vm851_vm2, %v638_v8  ;;  %646 = vmatpush1.bf16.msk.msra.mxu1 %vm851_vm2, %v638_v8  ;;  %s797_s18 = smov 40   ;;  %s798_s19 = smov [#allocation7]   ;;  %vm591_vm8 = vcmask 326656   ;;  %vm593_vm9 = vcmask 392192  }
  0x2c   :  { %231 = vrot.lane.b32.xlu0 %v41_v2, %s791_s1  ;;  %397 = vrot.lane.b32.xlu1 %v41_v2, %s792_s12  ;;  %v55_v18 = vrot.slane %v46_v17, %v54_v16  ;;  %v51_v26 = vrot.slane %v46_v17, %v50_v25  ;;  %s601_s20 = sshll.u32 %s798_s19, 4  ;;  %s602_s20 = int_to_ptr.vmem [resolvable:$true] %s601_s20 }
  0x2d   :  { %649 = vmatprep.subr.msk.bf16.mxu0 %vm851_vm2, %v635_v5  ;;  %655 = vmatprep.subr.msk.bf16.mxu1 %vm851_vm2, %v635_v5  ;;  %s755_s21 = scalar_lea.vmem %s602_s20, 128  ;;  %p760_p3 = scmp.lt.s32.totalorder %s602_s20, %s602_s20 }
  0x2e   :  { %613 = vmatmul.mubr.msk.f32.vlgmr.msra.gmra.mrb[0].mxu0 %vm58_vm3, %v41_v2  ;;  %p756_p2 = scmp.ne.s32.totalorder %s602_s20, %s755_s21  ;;  %p761_p4 = scmp.lt.s32.totalorder %s755_s21, %s755_s21 }
  0x2f   :  { %652 = vmatpush1.bf16.msk.msra.mxu0 %vm851_vm2, %v638_v8  ;;  %299 = vmatprep.mubr.f32.mxu0 %v787_v0 }
  0x30   :  { %480 = vrot.lane.b32.xlu0 %v41_v2, %s793_s13  ;;  %661 = vmatprep.subr.msk.bf16.mxu0 %vm851_vm2, %v635_v5  ;;  %p762_p5 = por %p761_p4, %p760_p3 }
  0x32   :  { %p763_p6 = pnand %p762_p5, %p756_p2 }
  0x9a   :  { %v149_v9 = vpop.permute.xlu0 %148  ;;  %v315_v10 = vpop.permute.xlu1 %314 }
  0x9b   :  { %617 = vmatmul.mubr.msk.f32.vlgmr.msra.gmra.mrb[0].mxu1 %vm58_vm3, %v149_v9 }
  0x9c   :  { %658 = vmatpush1.bf16.msk.msra.mxu1 %vm851_vm2, %v638_v8  ;;  %382 = vmatprep.mubr.f32.mxu1 %v787_v0 }
  0x9d   :  { %667 = vmatprep.subr.msk.bf16.mxu1 %vm851_vm2, %v635_v5 }
  0x9e   :  { %v232_v11 = vpop.permute.xlu0 %231  ;;  %v398_v12 = vpop.permute.xlu1 %397 }
  0x9f   :  { %621 = vmatmul.mubr.msk.f32.vlgmr.msra.gmra.mrb[2].mxu0 %vm58_vm3, %v232_v11  ;;  %625 = vmatmul.mubr.msk.f32.vlgmr.msra.gmra.mrb[2].mxu1 %vm58_vm3, %v315_v10 }
  0xa0   :  { %664 = vmatpush1.bf16.msk.msra.mxu0 %vm851_vm2, %v638_v8  ;;  %670 = vmatpush1.bf16.msk.msra.mxu1 %vm851_vm2, %v638_v8 }
  0xa1   :  { %548 = vmatprep.mubr.f32.mxu1 %v787_v0  ;;  %465 = vmatprep.mubr.f32.mxu0 %v787_v0 }
  0xa2   :  { %v481_v13 = vpop.permute.xlu0 %480 }
  0xa3   :  { %629 = vmatmul.mubr.msk.f32.vlgmr.msra.gmra.mrb[4].mxu0 %vm58_vm3, %v398_v12  ;;  %633 = vmatmul.mubr.msk.f32.vlgmr.msra.gmra.mrb[4].mxu1 %vm58_vm3, %v481_v13 }
 0x101   :  { %v135_v19 = vpop.f32.mrb[0].mxu0 }
 0x102   :  { %v137_v20 = vpop.f32.mrb[1].mxu0  ;;  %v136_v27 = vadd.f32 %v135_v19, %v51_v26 }
 0x103   :  { %v138_v21 = vadd.f32 %v137_v20, %v55_v18 }
 0x105   :  { %v614_v22 = vmul.f32 -1.442695, %v138_v21 }
 0x107   :  { %687 = vpow2.f32 %v614_v22 }
 0x111   :  { %v688_v23 = vpop.eup %687 }
 0x112   :  { %v143_v24 = vadd.f32 1.0, %v688_v23 }
 0x114   :  { %689 = vrcp.f32 %v143_v24 }
 0x11e   :  { %v690_v28 = vpop.eup %689 }
 0x11f   :  { %v888_v29 = vadd.f32 %v690_v28, %v136_v27 }
 0x121   :  { %v147_v17 = vmax.f32 %v888_v29, 0.0 }
 0x16e   :  { %v218_v30 = vpop.f32.mrb[0].mxu1 }
 0x16f   :  { %v220_v31 = vpop.f32.mrb[1].mxu1  ;;  %v219_v60 = vadd.f32 %v218_v30, %v51_v26 }
 0x170   :  { %v221_v32 = vadd.f32 %v220_v31, %v55_v18 }
 0x172   :  { %v618_v33 = vmul.f32 -1.442695, %v221_v32  ;;  %v301_v34 = vpop.f32.mrb[2].mxu0  ;;  %v384_v35 = vpop.f32.mrb[2].mxu1 }
 0x173   :  { %v303_v36 = vpop.f32.mrb[3].mxu0  ;;  %v386_v37 = vpop.f32.mrb[3].mxu1  ;;  %v302_v63 = vadd.f32 %v301_v34, %v51_v26  ;;  %v385_v2 = vadd.f32 %v384_v35, %v51_v26 }
 0x174   :  { %691 = vpow2.f32 %v618_v33  ;;  %v304_v38 = vadd.f32 %v303_v36, %v55_v18  ;;  %v387_v39 = vadd.f32 %v386_v37, %v55_v18 }
 0x176   :  { %v622_v40 = vmul.f32 -1.442695, %v304_v38  ;;  %v626_v41 = vmul.f32 -1.442695, %v387_v39  ;;  %v467_v42 = vpop.f32.mrb[4].mxu0  ;;  %v550_v43 = vpop.f32.mrb[4].mxu1 }
 0x177   :  { %v469_v44 = vpop.f32.mrb[5].mxu0  ;;  %v552_v45 = vpop.f32.mrb[5].mxu1  ;;  %v468_v6 = vadd.f32 %v467_v42, %v51_v26  ;;  %v551_v9 = vadd.f32 %v550_v43, %v51_v26 }
 0x178   :  { %693 = vpow2.f32 %v622_v40  ;;  %v470_v46 = vadd.f32 %v469_v44, %v55_v18  ;;  %v553_v47 = vadd.f32 %v552_v45, %v55_v18 }
 0x179   :  { %695 = vpow2.f32 %v626_v41 }
 0x17a   :  { %v630_v48 = vmul.f32 -1.442695, %v470_v46  ;;  %v634_v49 = vmul.f32 -1.442695, %v553_v47 }
 0x17c   :  { %697 = vpow2.f32 %v630_v48 }
 0x17d   :  { %699 = vpow2.f32 %v634_v49 }
 0x17e   :  { %v692_v50 = vpop.eup %691 }
 0x17f   :  { %v226_v51 = vadd.f32 1.0, %v692_v50 }
 0x181   :  { %701 = vrcp.f32 %v226_v51 }
 0x182   :  { %v694_v52 = vpop.eup %693 }
 0x183   :  { %v696_v53 = vpop.eup %695  ;;  %v309_v54 = vadd.f32 1.0, %v694_v52 }
 0x184   :  { %v392_v55 = vadd.f32 1.0, %v696_v53 }
 0x185   :  { %703 = vrcp.f32 %v309_v54 }
 0x186   :  { %v698_v56 = vpop.eup %697  ;;  %705 = vrcp.f32 %v392_v55 }
 0x187   :  { %v700_v57 = vpop.eup %699  ;;  %v475_v58 = vadd.f32 1.0, %v698_v56 }
 0x188   :  { %v558_v59 = vadd.f32 1.0, %v700_v57 }
 0x189   :  { %707 = vrcp.f32 %v475_v58 }
 0x18a   :  { %709 = vrcp.f32 %v558_v59 }
 0x18b   :  { %v702_v61 = vpop.eup %701 }
 0x18c   :  { %v229_v62 = vadd.f32 %v702_v61, %v219_v60 }
 0x18e   :  { %v230_v0 = vmax.f32 %v229_v62, 0.0 }
 0x18f   :  { %v704_v1 = vpop.eup %703 }
 0x190   :  { %v706_v3 = vpop.eup %705  ;;  %564 = vrot.lane.b32.xlu1 %v230_v0, %s794_s2  ;;  %v312_v4 = vadd.f32 %v704_v1, %v302_v63 }
 0x191   :  { %v395_v5 = vadd.f32 %v706_v3, %v385_v2 }
 0x192   :  { %v313_v7 = vmax.f32 %v312_v4, 0.0 }
 0x193   :  { %v708_v8 = vpop.eup %707  ;;  %v396_v10 = vmax.f32 %v395_v5, 0.0 }
 0x194   :  { %v710_v11 = vpop.eup %709  ;;  %568 = vrot.lane.b32.xlu0 %v313_v7, %s786_s7  ;;  %v478_v12 = vadd.f32 %v708_v8, %v468_v6 }
 0x195   :  { %572 = vrot.lane.b32.xlu1 %v396_v10, %s795_s16  ;;  %v561_v13 = vadd.f32 %v710_v11, %v551_v9 }
 0x196   :  { %v479_v14 = vmax.f32 %v478_v12, 0.0 }
 0x197   :  { %v562_v15 = vmax.f32 %v561_v13, 0.0 }
 0x198   :  { %576 = vrot.lane.b32.xlu0 %v479_v14, %s796_s17 }
 0x199   :  { %580 = vrot.lane.b32.xlu1 %v562_v15, %s797_s18 }
 0x202   :  { %v565_v16 = vpop.permute.xlu1 %564 }
 0x203   :  { %v584_v18 = vsel %vm583_vm4, %v147_v17, %v565_v16 }
 0x206   :  { %v569_v19 = vpop.permute.xlu0 %568 }
 0x207   :  { %v573_v20 = vpop.permute.xlu1 %572  ;;  %v586_v21 = vsel %vm585_vm5, %v584_v18, %v569_v19 }
 0x208   :  { %v588_v23 = vsel %vm587_vm6, %v586_v21, %v573_v20 }
 0x20a   :  { %v577_v22 = vpop.permute.xlu0 %576 }
 0x20b   :  { %v581_v24 = vpop.permute.xlu1 %580  ;;  %v590_v25 = vsel %vm589_vm7, %v588_v23, %v577_v22 }
 0x20c   :  { %v592_v26 = vsel %vm591_vm8, %v590_v25, %v581_v24 }
 0x20d   :  { %594 = vst.msk [vmem:[#allocation7] sm:$0xff] %vm593_vm9, %v592_v26 }
 0x20e   :  { %766 = shalt.err (!%p763_p6)
}
 0x20f   :  { %s767_s24 = scalar_lea.hbm %s907_s3, 128 }
 0x210   :  { %p768_p7 = scmp.ne.s32.totalorder %s907_s3, %s767_s24  ;;  %p771_p8 = scmp.lt.u32.totalorder %s767_s24, %s907_s3 }
 0x212   :  { %p773_p9 = pnand %p771_p8, %p768_p7 }
 0x214   :  { %776 = shalt.err (!%p773_p9)
}
 0x215   :  { %604 = dma.vmem_to_hbm [thread:$0]  %s602_s20, 128, %s907_s3, [#allocation4]  }
 0x216   :  { %781 = dma.done.wait [#allocation4], 128  }
 0x217   :  { %782 = vsyncadd [#allocation4], 4294967168 }
 0x218   :  { %608 = vsyncpa [#allocation3], 1 }
 0x219   :  { %609 = vsyncpa [#allocation6], 1 }
 0x21a   :  { %610 = vsyncpa [#allocation4], 1 }

</bundles_post_ra>
